<compile_context>
chip_gen: v7x
topology: tpu7x:2x2x1
jax: 0.10.0
libtpu: 0.0.40
codegen_flags: <defaults>
</compile_context>

<pallas_src>
from functools import partial

import jax
import jax.numpy as jnp
from jax.experimental import pallas as pl
from jax.experimental.pallas import tpu as pltpu

IN_FEATURES = 28 * 28          # 784
HIDDEN = 28
NUM_CLASSES = 10


def _round_up(x, m):
    return ((x + m - 1) // m) * m


def mnist_kernel(x_ref, w1_ref, b1_ref, w2_ref, b2_ref, o_ref):
    # x_ref:  (TB, 784)   w1_ref: (784, 28)  b1_ref: (1, 28)
    # w2_ref: (28, 10)    b2_ref: (1, 10)    o_ref:  (TB, 10)
    x = x_ref[...]

    # fc1 + ReLU (VPU/MXU work rides for free under the dominant x DMA).
    h = jnp.dot(x, w1_ref[...], preferred_element_type=jnp.float32) + b1_ref[...]
    h = jnp.maximum(h, 0.0)

    # fc2 -> (TB, 10) logits.
    logits = jnp.dot(h, w2_ref[...], preferred_element_type=jnp.float32) + b2_ref[...]

    # Numerically stable log_softmax over the class dimension.
    m = jnp.max(logits, axis=-1, keepdims=True)
    shifted = logits - m
    lse = jnp.log(jnp.sum(jnp.exp(shifted), axis=-1, keepdims=True))
    o_ref[...] = shifted - lse


@partial(jax.jit, static_argnames=("tile_rows",))
def mnist_net_forward(x_nchw, w1, b1, w2, b2, *, tile_rows=2048):
    """x_nchw: (B, 1, 28, 28) float32.  Returns (B, 10) log-probabilities.

    w1: (784, 28), b1: (28,), w2: (28, 10), b2: (10,)  -- (in, out) layout, i.e.
    the transpose of nn.Linear's weight, so the kernel computes y = x @ W + b.
    """
    B = x_nchw.shape[0]
    x2d = x_nchw.reshape(B, IN_FEATURES).astype(jnp.float32)   # same as .view(-1, 784)

    if B <= tile_rows:
        # Single block covering the whole batch: block dim == full array dim is
        # always a legal TPU block shape, so no padding is needed for any B.
        TB = B
    else:
        TB = max(8, (tile_rows // 8) * 8)   # multiple of 8; last block may be partial
        steps = pl.cdiv(B, TB)
        # v7x megacore: prefer an even number of grid steps so both TensorCores
        # stay busy (no-op effect on single-TC v5e/v6e).
        if steps % 2 == 1:
            TB = _round_up(pl.cdiv(B, steps + 1), 8)

    grid = (pl.cdiv(B, TB),)

    b1_2d = b1.reshape(1, HIDDEN).astype(jnp.float32)
    b2_2d = b2.reshape(1, NUM_CLASSES).astype(jnp.float32)

    out = pl.pallas_call(
        mnist_kernel,
        out_shape=jax.ShapeDtypeStruct((B, NUM_CLASSES), jnp.float32),
        grid=grid,
        in_specs=[
            pl.BlockSpec((TB, IN_FEATURES), lambda i: (i, 0)),        # x: tiled over batch
            pl.BlockSpec((IN_FEATURES, HIDDEN), lambda i: (0, 0)),    # w1: resident in VMEM
            pl.BlockSpec((1, HIDDEN), lambda i: (0, 0)),              # b1: resident
            pl.BlockSpec((HIDDEN, NUM_CLASSES), lambda i: (0, 0)),    # w2: resident
            pl.BlockSpec((1, NUM_CLASSES), lambda i: (0, 0)),         # b2: resident
        ],
        out_specs=pl.BlockSpec((TB, NUM_CLASSES), lambda i: (i, 0)),
        compiler_params=pltpu.CompilerParams(
            dimension_semantics=("parallel",),      # v7x shards grid steps across 2 TCs
            vmem_limit_bytes=48 << 20,              # TB=2048 f32 needs > v5e's 16 MiB default;
                                                    # 48 MiB stays under v7x's 64 MiB physical
        ),
    )(x2d, w1.astype(jnp.float32), b1_2d, w2.astype(jnp.float32), b2_2d)

    return out


def init_params(key):
    """Deterministic init mimicking nn.Linear's U(-1/sqrt(fan_in), 1/sqrt(fan_in))."""
    k1, k2, k3, k4 = jax.random.split(key, 4)
    lim1 = 1.0 / jnp.sqrt(784.0)
    lim2 = 1.0 / jnp.sqrt(28.0)
    w1 = jax.random.uniform(k1, (IN_FEATURES, HIDDEN), jnp.float32, -lim1, lim1)
    b1 = jax.random.uniform(k2, (HIDDEN,), jnp.float32, -lim1, lim1)
    w2 = jax.random.uniform(k3, (HIDDEN, NUM_CLASSES), jnp.float32, -lim2, lim2)
    b2 = jax.random.uniform(k4, (NUM_CLASSES,), jnp.float32, -lim2, lim2)
    return w1, b1, w2, b2


def _reference(x_nchw, w1, b1, w2, b2):
    x = x_nchw.reshape(x_nchw.shape[0], -1)
    h = jnp.maximum(x @ w1 + b1, 0.0)
    logits = h @ w2 + b2
    return jax.nn.log_softmax(logits, axis=-1)


if __name__ == "__main__":
    key = jax.random.PRNGKey(0)
    kx, kp = jax.random.split(key)

    B = 2
    x = jax.random.normal(kx, (B, 1, 28, 28), jnp.float32)
    w1, b1, w2, b2 = init_params(kp)

    out = mnist_net_forward(x, w1, b1, w2, b2)
    out = jax.block_until_ready(out)

    ref = _reference(x, w1, b1, w2, b2)
    assert out.shape == (B, NUM_CLASSES)
    assert jnp.allclose(out, ref, atol=1e-5, rtol=1e-5)

    # Also exercise the multi-step grid with a partial boundary block (no padding).
    B2 = 2050
    x_big = jax.random.normal(kx, (B2, 1, 28, 28), jnp.float32)
    out_big = jax.block_until_ready(mnist_net_forward(x_big, w1, b1, w2, b2))
    ref_big = _reference(x_big, w1, b1, w2, b2)
    assert out_big.shape == (B2, NUM_CLASSES)
    assert jnp.allclose(out_big, ref_big, atol=1e-5, rtol=1e-5)

    print("KERNEL_OK")
</pallas_src>

<mosaic_0001>
module attributes {stable_mosaic.version = 11 : i64} {
  func.func @mnist_kernel(%arg0: i32, %arg1: memref<2x784xf32, #tpu.memory_space<vmem>>, %arg2: memref<784x28xf32, #tpu.memory_space<vmem>>, %arg3: memref<1x28xf32, #tpu.memory_space<vmem>>, %arg4: memref<28x10xf32, #tpu.memory_space<vmem>>, %arg5: memref<1x10xf32, #tpu.memory_space<vmem>>, %arg6: memref<2x10xf32, #tpu.memory_space<vmem>>) attributes {dimension_semantics = [#tpu.dimension_semantics<parallel>], iteration_bounds = array<i64: 1>, scalar_prefetch = 0 : i64, scratch_operands = 0 : i64, tpu.core_type = #tpu.core_type<tc>, window_params = [{transform_indices = @transform_0, window_bounds = array<i64: 2, 784>}, {pipeline_mode = #tpu.pipeline_mode<synchronous>, transform_indices = @transform_1, window_bounds = array<i64: 784, 28>}, {pipeline_mode = #tpu.pipeline_mode<synchronous>, transform_indices = @transform_2, window_bounds = array<i64: 1, 28>}, {pipeline_mode = #tpu.pipeline_mode<synchronous>, transform_indices = @transform_3, window_bounds = array<i64: 28, 10>}, {pipeline_mode = #tpu.pipeline_mode<synchronous>, transform_indices = @transform_4, window_bounds = array<i64: 1, 10>}, {transform_indices = @transform_5, window_bounds = array<i64: 2, 10>}]} {
    %c0 = arith.constant 0 : index
    %c0_0 = arith.constant 0 : index
    %0 = vector.load %arg1[%c0, %c0_0] : memref<2x784xf32, #tpu.memory_space<vmem>>, vector<2x784xf32>
    %c0_1 = arith.constant 0 : index
    %c0_2 = arith.constant 0 : index
    %1 = vector.load %arg2[%c0_1, %c0_2] : memref<784x28xf32, #tpu.memory_space<vmem>>, vector<784x28xf32>
    %cst = arith.constant dense<0.000000e+00> : vector<2x28xf32>
    %2 = tpu.matmul %0, %1, %cst {dimension_numbers = #tpu.dot_dimension_numbers<[1], [0], [0], [1], [0, 0, 1, 1], [], []>} : vector<2x784xf32>, vector<784x28xf32>, vector<2x28xf32> -> vector<2x28xf32>
    %c0_3 = arith.constant 0 : index
    %c0_4 = arith.constant 0 : index
    %3 = vector.load %arg3[%c0_3, %c0_4] : memref<1x28xf32, #tpu.memory_space<vmem>>, vector<1x28xf32>
    %4 = vector.broadcast %3 : vector<1x28xf32> to vector<2x28xf32>
    %5 = arith.addf %2, %4 : vector<2x28xf32>
    %cst_5 = arith.constant 0.000000e+00 : f32
    %6 = vector.broadcast %cst_5 : f32 to vector<2x28xf32>
    %7 = arith.maximumf %5, %6 : vector<2x28xf32>
    %c0_6 = arith.constant 0 : index
    %c0_7 = arith.constant 0 : index
    %8 = vector.load %arg4[%c0_6, %c0_7] : memref<28x10xf32, #tpu.memory_space<vmem>>, vector<28x10xf32>
    %cst_8 = arith.constant dense<0.000000e+00> : vector<2x10xf32>
    %9 = tpu.matmul %7, %8, %cst_8 {dimension_numbers = #tpu.dot_dimension_numbers<[1], [0], [0], [1], [0, 0, 1, 1], [], []>} : vector<2x28xf32>, vector<28x10xf32>, vector<2x10xf32> -> vector<2x10xf32>
    %c0_9 = arith.constant 0 : index
    %c0_10 = arith.constant 0 : index
    %10 = vector.load %arg5[%c0_9, %c0_10] : memref<1x10xf32, #tpu.memory_space<vmem>>, vector<1x10xf32>
    %11 = vector.broadcast %10 : vector<1x10xf32> to vector<2x10xf32>
    %12 = arith.addf %9, %11 : vector<2x10xf32>
    %cst_11 = arith.constant dense<0xFF800000> : vector<2xf32>
    %13 = vector.multi_reduction <maximumf>, %12, %cst_11 [1] : vector<2x10xf32> to vector<2xf32>
    %14 = vector.shape_cast %13 : vector<2xf32> to vector<2x1xf32>
    %15 = vector.broadcast %14 : vector<2x1xf32> to vector<2x10xf32>
    %16 = arith.subf %12, %15 : vector<2x10xf32>
    %17 = math.exp %16 : vector<2x10xf32>
    %cst_12 = arith.constant dense<0.000000e+00> : vector<2xf32>
    %18 = vector.multi_reduction <add>, %17, %cst_12 [1] : vector<2x10xf32> to vector<2xf32>
    %19 = vector.shape_cast %18 : vector<2xf32> to vector<2x1xf32>
    %20 = math.log %19 : vector<2x1xf32>
    %21 = vector.broadcast %20 : vector<2x1xf32> to vector<2x10xf32>
    %22 = arith.subf %16, %21 : vector<2x10xf32>
    %c0_13 = arith.constant 0 : index
    %c0_14 = arith.constant 0 : index
    %23 = vector.load %arg6[%c0_13, %c0_14] : memref<2x10xf32, #tpu.memory_space<vmem>>, vector<2x10xf32>
    tpu.vector_store %arg6[%c0_13, %c0_14], %22 {strides = array<i32>} : memref<2x10xf32, #tpu.memory_space<vmem>>, vector<2x10xf32>,
    return
  }
  func.func @transform_0(%arg0: i32) -> (i32, i32) {
    %c0_i32 = arith.constant 0 : i32
    %c0_i32_0 = arith.constant 0 : i32
    return %arg0, %c0_i32 : i32, i32
  }
  func.func @transform_1(%arg0: i32) -> (i32, i32) {
    %c0_i32 = arith.constant 0 : i32
    %c0_i32_0 = arith.constant 0 : i32
    %c0_i32_1 = arith.constant 0 : i32
    return %c0_i32, %c0_i32_0 : i32, i32
  }
  func.func @transform_2(%arg0: i32) -> (i32, i32) {
    %c0_i32 = arith.constant 0 : i32
    %c0_i32_0 = arith.constant 0 : i32
    %c0_i32_1 = arith.constant 0 : i32
    return %c0_i32, %c0_i32_0 : i32, i32
  }
  func.func @transform_3(%arg0: i32) -> (i32, i32) {
    %c0_i32 = arith.constant 0 : i32
    %c0_i32_0 = arith.constant 0 : i32
    %c0_i32_1 = arith.constant 0 : i32
    return %c0_i32, %c0_i32_0 : i32, i32
  }
  func.func @transform_4(%arg0: i32) -> (i32, i32) {
    %c0_i32 = arith.constant 0 : i32
    %c0_i32_0 = arith.constant 0 : i32
    %c0_i32_1 = arith.constant 0 : i32
    return %c0_i32, %c0_i32_0 : i32, i32
  }
  func.func @transform_5(%arg0: i32) -> (i32, i32) {
    %c0_i32 = arith.constant 0 : i32
    %c0_i32_0 = arith.constant 0 : i32
    return %arg0, %c0_i32 : i32, i32
  }
}

</mosaic_0001>

<bundles_post_ra>
// kernel: mnist_net_forward.1
= control target key start
LH: loop header
LB: loop body
LE: loop exit
PB: predicated region body
PF: predicated region fallthrough
CT: control target
= control target key end

     0   :  { %v848_v43 = vmov 1983009808   ;;  %v134_v45 = vlaneseq  ;;  %s1231_s0 = inlined_call_operand.vmem [shape: f32[2,784], index: 0, kind: input, shape index: {}]   ;;  %s1232_s1 = inlined_call_operand.vmem [shape: f32[784,28], index: 1, kind: input, shape index: {}]   ;;  %s1233_s2 = inlined_call_operand.vmem [shape: f32[1,28], index: 2, kind: input, shape index: {}]   ;;  %s1234_s3 = inlined_call_operand.vmem [shape: f32[28,10], index: 3, kind: input, shape index: {}]   ;;  %s1235_s4 = inlined_call_operand.vmem [shape: f32[1,10], index: 4, kind: input, shape index: {}]   ;;  %s1236_s5 = inlined_call_operand.hbm [shape: f32[2,10], index: 5, kind: output, shape index: {}]  }
   0x1   :  { %v39_v0 = vld [vmem:[%s1232_s1 + $0x80] sm:$0xff]  ;;  %v40_v1 = vld [vmem:[%s1232_s1 + $0x88] sm:$0xff]  ;;  %v41_v11 = vld [vmem:[%s1232_s1 + $0x90] sm:$0xff]  ;;  %v132_v44 = vunpack.c.l.s4 %v848_v43 }
   0x2   :  { %v23_v2 = vld [vmem:[%s1232_s1] sm:$0xff]  ;;  %v706_v3 = vpack.c.bf16 %v40_v1, %v39_v0  ;;  %v24_v4 = vld [vmem:[%s1232_s1 + $0x8] sm:$0xff]  ;;  %v42_v13 = vld [vmem:[%s1232_s1 + $0x98] sm:$0xff]  ;;  %v135_v60 = vshrl.u32 %v134_v45, 7 }
   0x3   :  { %v71_v5 = vld [vmem:[%s1232_s1 + $0x180] sm:$0xff]  ;;  %v72_v6 = vld [vmem:[%s1232_s1 + $0x188] sm:$0xff]  ;;  %v708_v7 = vpack.c.bf16 %v24_v4, %v23_v2  ;;  %v25_v14 = vld [vmem:[%s1232_s1 + $0x10] sm:$0xff]  ;;  %v710_v16 = vpack.c.bf16 %v42_v13, %v41_v11  ;;  %v133_v59 = vunpack.c.0.s8 %v132_v44 }
   0x4   :  { %v738_v8 = vpack.c.bf16 %v72_v6, %v71_v5  ;;  %v55_v9 = vld [vmem:[%s1232_s1 + $0x100] sm:$0xff]  ;;  %v56_v10 = vld [vmem:[%s1232_s1 + $0x108] sm:$0xff]  ;;  %707 = vmatprep.subr.bf16.mxu0 %v706_v3  ;;  %v26_v15 = vld [vmem:[%s1232_s1 + $0x18] sm:$0xff] }
   0x5   :  { %v740_v12 = vpack.c.bf16 %v56_v10, %v55_v9  ;;  %709 = vmatpush3.bf16.msra.mxu0 %v708_v7  ;;  %v712_v17 = vpack.c.bf16 %v26_v15, %v25_v14  ;;  %v73_v18 = vld [vmem:[%s1232_s1 + $0x190] sm:$0xff]  ;;  %v74_v19 = vld [vmem:[%s1232_s1 + $0x198] sm:$0xff]  ;;  %v43_v23 = vld [vmem:[%s1232_s1 + $0xa0] sm:$0xff]  ;;  %v1028_v10 = vsub.s32 %v133_v59, %v135_v60 }
   0x6   :  { %739 = vmatprep.subr.bf16.mxu1 %v738_v8  ;;  %v57_v20 = vld [vmem:[%s1232_s1 + $0x110] sm:$0xff]  ;;  %v742_v21 = vpack.c.bf16 %v74_v19, %v73_v18  ;;  %v58_v22 = vld [vmem:[%s1232_s1 + $0x118] sm:$0xff]  ;;  %v44_v24 = vld [vmem:[%s1232_s1 + $0xa8] sm:$0xff]  ;;  %711 = vmatprep.subr.bf16.mxu0 %v710_v16 }
   0x7   :  { %741 = vmatpush3.bf16.msra.mxu1 %v740_v12  ;;  %v744_v25 = vpack.c.bf16 %v58_v22, %v57_v20  ;;  %v714_v26 = vpack.c.bf16 %v44_v24, %v43_v23  ;;  %v27_v27 = vld [vmem:[%s1232_s1 + $0x20] sm:$0xff]  ;;  %v28_v28 = vld [vmem:[%s1232_s1 + $0x28] sm:$0xff]  ;;  %v45_v35 = vld [vmem:[%s1232_s1 + $0xb0] sm:$0xff] }
   0x8   :  { %v75_v29 = vld [vmem:[%s1232_s1 + $0x1a0] sm:$0xff]  ;;  %743 = vmatprep.subr.bf16.mxu1 %v742_v21  ;;  %v76_v30 = vld [vmem:[%s1232_s1 + $0x1a8] sm:$0xff]  ;;  %v716_v33 = vpack.c.bf16 %v28_v28, %v27_v27  ;;  %v46_v36 = vld [vmem:[%s1232_s1 + $0xb8] sm:$0xff] }
   0x9   :  { %v59_v31 = vld [vmem:[%s1232_s1 + $0x120] sm:$0xff]  ;;  %v60_v32 = vld [vmem:[%s1232_s1 + $0x128] sm:$0xff]  ;;  %713 = vmatpush3.bf16.msra.mxu0 %v712_v17  ;;  %v746_v34 = vpack.c.bf16 %v76_v30, %v75_v29  ;;  %v29_v37 = vld [vmem:[%s1232_s1 + $0x30] sm:$0xff]  ;;  %v718_v39 = vpack.c.bf16 %v46_v36, %v45_v35 }
   0xa   :  { %715 = vmatprep.subr.bf16.mxu0 %v714_v26  ;;  %v748_v38 = vpack.c.bf16 %v60_v32, %v59_v31  ;;  %v30_v40 = vld [vmem:[%s1232_s1 + $0x38] sm:$0xff]  ;;  %v77_v41 = vld [vmem:[%s1232_s1 + $0x1b0] sm:$0xff]  ;;  %v47_v49 = vld [vmem:[%s1232_s1 + $0xc0] sm:$0xff] }
   0xb   :  { %745 = vmatpush3.bf16.msra.mxu1 %v744_v25  ;;  %v78_v42 = vld [vmem:[%s1232_s1 + $0x1b8] sm:$0xff]  ;;  %v61_v47 = vld [vmem:[%s1232_s1 + $0x130] sm:$0xff]  ;;  %v48_v50 = vld [vmem:[%s1232_s1 + $0xc8] sm:$0xff]  ;;  %v720_v51 = vpack.c.bf16 %v30_v40, %v29_v37 }
   0xc   :  { %747 = vmatprep.subr.bf16.mxu1 %v746_v34  ;;  %v750_v46 = vpack.c.bf16 %v78_v42, %v77_v41  ;;  %v62_v48 = vld [vmem:[%s1232_s1 + $0x138] sm:$0xff]  ;;  %v79_v52 = vld [vmem:[%s1232_s1 + $0x1c0] sm:$0xff]  ;;  %v80_v53 = vld [vmem:[%s1232_s1 + $0x1c8] sm:$0xff]  ;;  %v722_v55 = vpack.c.bf16 %v48_v50, %v47_v49 }
   0xd   :  { %717 = vmatpush3.bf16.msra.mxu0 %v716_v33  ;;  %v752_v54 = vpack.c.bf16 %v62_v48, %v61_v47  ;;  %v31_v56 = vld [vmem:[%s1232_s1 + $0x40] sm:$0xff]  ;;  %v32_v57 = vld [vmem:[%s1232_s1 + $0x48] sm:$0xff]  ;;  %v754_v61 = vpack.c.bf16 %v80_v53, %v79_v52  ;;  %v49_v63 = vld [vmem:[%s1232_s1 + $0xd0] sm:$0xff] }
   0xe   :  { %719 = vmatprep.subr.bf16.mxu0 %v718_v39  ;;  %v63_v58 = vld [vmem:[%s1232_s1 + $0x140] sm:$0xff]  ;;  %v64_v62 = vld [vmem:[%s1232_s1 + $0x148] sm:$0xff]  ;;  %v50_v0 = vld [vmem:[%s1232_s1 + $0xd8] sm:$0xff]  ;;  %v724_v3 = vpack.c.bf16 %v32_v57, %v31_v56 }
   0xf   :  { %749 = vmatpush3.bf16.msra.mxu1 %v748_v38  ;;  %v81_v1 = vld [vmem:[%s1232_s1 + $0x1d0] sm:$0xff]  ;;  %v82_v2 = vld [vmem:[%s1232_s1 + $0x1d8] sm:$0xff]  ;;  %v756_v5 = vpack.c.bf16 %v64_v62, %v63_v58  ;;  %v726_v6 = vpack.c.bf16 %v50_v0, %v49_v63  ;;  %v51_v12 = vld [vmem:[%s1232_s1 + $0xe0] sm:$0xff] }
  0x10   :  { %751 = vmatprep.subr.bf16.mxu1 %v750_v46  ;;  %v33_v4 = vld [vmem:[%s1232_s1 + $0x50] sm:$0xff]  ;;  %v34_v7 = vld [vmem:[%s1232_s1 + $0x58] sm:$0xff]  ;;  %v758_v11 = vpack.c.bf16 %v82_v2, %v81_v1  ;;  %v52_v13 = vld [vmem:[%s1232_s1 + $0xe8] sm:$0xff] }
  0x11   :  { %721 = vmatpush3.bf16.msra.mxu0 %v720_v51  ;;  %v65_v8 = vld [vmem:[%s1232_s1 + $0x150] sm:$0xff]  ;;  %v66_v9 = vld [vmem:[%s1232_s1 + $0x158] sm:$0xff]  ;;  %v83_v14 = vld [vmem:[%s1232_s1 + $0x1e0] sm:$0xff]  ;;  %v728_v16 = vpack.c.bf16 %v34_v7, %v33_v4  ;;  %v730_v19 = vpack.c.bf16 %v52_v13, %v51_v12 }
  0x12   :  { %723 = vmatprep.subr.bf16.mxu0 %v722_v55  ;;  %v84_v15 = vld [vmem:[%s1232_s1 + $0x1e8] sm:$0xff]  ;;  %v760_v17 = vpack.c.bf16 %v66_v9, %v65_v8  ;;  %v21_v18 = vld [vmem:[%s1231_s0] sm:$0xff]  ;;  %v53_v27 = vld [vmem:[%s1232_s1 + $0xf0] sm:$0xff] }
  0x13   :  { %753 = vmatpush3.bf16.msra.mxu1 %v752_v54  ;;  %v35_v20 = vld [vmem:[%s1232_s1 + $0x60] sm:$0xff]  ;;  %v36_v21 = vld [vmem:[%s1232_s1 + $0x68] sm:$0xff]  ;;  %v137_v23 = vrot.slane %v21_v18, %v1028_v10  ;;  %v130_v24 = vcombine.high %v21_v18, %v21_v18  ;;  %v762_v25 = vpack.c.bf16 %v84_v15, %v83_v14  ;;  %v54_v28 = vld [vmem:[%s1232_s1 + $0xf8] sm:$0xff] }
  0x14   :  { %755 = vmatprep.subr.bf16.mxu1 %v754_v61  ;;  %v67_v22 = vld [vmem:[%s1232_s1 + $0x160] sm:$0xff]  ;;  %v68_v26 = vld [vmem:[%s1232_s1 + $0x168] sm:$0xff]  ;;  %v85_v29 = vld [vmem:[%s1232_s1 + $0x1f0] sm:$0xff]  ;;  %v732_v33 = vpack.c.bf16 %v36_v21, %v35_v20  ;;  %v734_v35 = vpack.c.bf16 %v54_v28, %v53_v27 }
  0x15   :  { %725 = vmatpush3.bf16.msra.mxu0 %v724_v3  ;;  %v86_v30 = vld [vmem:[%s1232_s1 + $0x1f8] sm:$0xff]  ;;  %v145_v31 = vcombine.high %v137_v23, %v137_v23  ;;  %v144_v32 = vrot.slane %v130_v24, %v1028_v10  ;;  %v764_v34 = vpack.c.bf16 %v68_v26, %v67_v22  ;;  %v37_v36 = vld [vmem:[%s1232_s1 + $0x70] sm:$0xff]  ;;  %v103_v42 = vld [vmem:[%s1232_s1 + $0x280] sm:$0xff] }
  0x16   :  { %727 = vmatprep.subr.bf16.mxu0 %v726_v6  ;;  %v38_v37 = vld [vmem:[%s1232_s1 + $0x78] sm:$0xff]  ;;  %v69_v38 = vld [vmem:[%s1232_s1 + $0x170] sm:$0xff]  ;;  %v766_v40 = vpack.c.bf16 %v86_v30, %v85_v29  ;;  %v104_v43 = vld [vmem:[%s1232_s1 + $0x288] sm:$0xff] }
  0x17   :  { %757 = vmatpush3.bf16.msra.mxu1 %v756_v5  ;;  %v146_v39 = vcombine.high %v144_v32, %v144_v32  ;;  %236 = vmatprep.mubr.f32.mxu0 %v145_v31  ;;  %v70_v41 = vld [vmem:[%s1232_s1 + $0x178] sm:$0xff]  ;;  %v736_v44 = vpack.c.bf16 %v38_v37, %v37_v36  ;;  %v770_v46 = vpack.c.bf16 %v104_v43, %v103_v42  ;;  %v87_v47 = vld [vmem:[%s1232_s1 + $0x200] sm:$0xff]  ;;  %v88_v48 = vld [vmem:[%s1232_s1 + $0x208] sm:$0xff] }
  0x18   :  { %759 = vmatprep.subr.bf16.mxu1 %v758_v11  ;;  %v768_v45 = vpack.c.bf16 %v70_v41, %v69_v38  ;;  %v105_v49 = vld [vmem:[%s1232_s1 + $0x290] sm:$0xff]  ;;  %v106_v50 = vld [vmem:[%s1232_s1 + $0x298] sm:$0xff]  ;;  %v772_v51 = vpack.c.bf16 %v88_v48, %v87_v47  ;;  %v22_v53 = vld [vmem:[%s1231_s0 + $0x8] sm:$0x3f] }
  0x19   :  { %729 = vmatpush3.bf16.msra.mxu0 %v728_v16  ;;  %306 = vmatprep.mubr.f32.mxu1 %v146_v39  ;;  %v89_v52 = vld [vmem:[%s1232_s1 + $0x210] sm:$0xff]  ;;  %v119_v54 = vld [vmem:[%s1232_s1 + $0x300] sm:$0xff]  ;;  %v774_v55 = vpack.c.bf16 %v106_v50, %v105_v49  ;;  %v90_v56 = vld [vmem:[%s1232_s1 + $0x218] sm:$0xff]  ;;  %v147_v57 = vcombine.high %v22_v53, %v22_v53  ;;  %v1114_v58 = vrot.slane %v22_v53, %v1028_v10 }
  0x1a   :  { %731 = vmatprep.subr.bf16.mxu0 %v730_v19  ;;  %v120_v59 = vld [vmem:[%s1232_s1 + $0x308] sm:$0xff] }
  0x1b   :  { %761 = vmatpush3.bf16.msra.mxu1 %v760_v17 }
  0x1c   :  { %763 = vmatprep.subr.bf16.mxu1 %v762_v25 }
  0x1d   :  { %733 = vmatpush3.bf16.msra.mxu0 %v732_v33 }
  0x1e   :  { %735 = vmatprep.subr.bf16.mxu0 %v734_v35 }
  0x1f   :  { %765 = vmatpush3.bf16.msra.mxu1 %v764_v34 }
  0x20   :  { %767 = vmatprep.subr.bf16.mxu1 %v766_v40 }
  0x21   :  { %737 = vmatpush3.bf16.msra.mxu0 %v736_v44 }
  0x22   :  { %771 = vmatprep.subr.bf16.mxu0 %v770_v46 }
  0x23   :  { %769 = vmatpush3.bf16.msra.mxu1 %v768_v45 }
  0x24   :  { %10 = vsyncpa [#allocation3], 0  ;;  %v107_v60 = vld [vmem:[%s1232_s1 + $0x2a0] sm:$0xff]  ;;  %v108_v61 = vld [vmem:[%s1232_s1 + $0x2a8] sm:$0xff]  ;;  %v849_v62 = vmov 0.0|0.0   ;;  %v803_v63 = vpack.c.bf16 %v120_v59, %v119_v54  ;;  %237 = vmatmul.mubr.f32.vlgmr.msra.gmra.mrb[0].mxu0 %v137_v23  ;;  %v162_v0 = vcombine.high %v1114_v58, %v1114_v58  ;;  %v776_v1 = vpack.c.bf16 %v90_v56, %v89_v52 }
  0x25   :  { %802 = vmatprep.subr.bf16.mxu1 %v849_v62  ;;  %773 = vmatpush3.bf16.msra.mxu0 %v772_v51  ;;  %v778_v2 = vpack.c.bf16 %v108_v61, %v107_v60  ;;  %v91_v3 = vld [vmem:[%s1232_s1 + $0x220] sm:$0xff]  ;;  %v92_v4 = vld [vmem:[%s1232_s1 + $0x228] sm:$0xff]  ;;  %v161_v5 = vrot.slane %v147_v57, %v1028_v10  ;;  %v109_v6 = vld [vmem:[%s1232_s1 + $0x2b0] sm:$0xff]  ;;  %vm850_vm0 = vmmov 0   ;;  %v851_v8 = vmov 0.0  }
  0x26   :  { %307 = vmatmul.mubr.f32.vlgmr.msra.gmra.mrb[0].mxu1 %v144_v32  ;;  %775 = vmatprep.subr.bf16.mxu0 %v774_v55  ;;  %v110_v7 = vld [vmem:[%s1232_s1 + $0x2b8] sm:$0xff]  ;;  %vm169_vm1 = vcmask 130048   ;;  %v780_v9 = vpack.c.bf16 %v92_v4, %v91_v3  ;;  %v93_v11 = vld [vmem:[%s1232_s1 + $0x230] sm:$0xff]  ;;  %v111_v13 = vld [vmem:[%s1232_s1 + $0x2c0] sm:$0xff]  ;;  %vm468_vm2 = vcmask 1043456   ;;  %vm852_vm3 = vmmov 1  }
  0x27   :  { %376 = vmatprep.mubr.f32.mxu0 %v162_v0  ;;  %804 = vmatpush3.bf16.msra.mxu1 %v803_v63  ;;  %v782_v10 = vpack.c.bf16 %v110_v7, %v109_v6  ;;  %v94_v12 = vld [vmem:[%s1232_s1 + $0x238] sm:$0xff]  ;;  %v112_v14 = vld [vmem:[%s1232_s1 + $0x2c8] sm:$0xff]  ;;  %v95_v17 = vld [vmem:[%s1232_s1 + $0x240] sm:$0xff]  ;;  %vm464_vm5 = vcmask 228352   ;;  %vm542_vm6 = vcmask 74752  }
  0x28   :  { %692 = vmatprep.mubr.msk.f32.mxu1 %vm850_vm0, %v851_v8  ;;  %805 = vmatprep.subr.bf16.mxu1 %v849_v62  ;;  %v784_v15 = vpack.c.bf16 %v94_v12, %v93_v11  ;;  %v786_v16 = vpack.c.bf16 %v112_v14, %v111_v13  ;;  %v96_v18 = vld [vmem:[%s1232_s1 + $0x248] sm:$0xff]  ;;  %v113_v19 = vld [vmem:[%s1232_s1 + $0x2d0] sm:$0xff]  ;;  %v114_v20 = vld [vmem:[%s1232_s1 + $0x2d8] sm:$0xff] }
  0x29   :  { %777 = vmatpush3.bf16.msra.mxu0 %v776_v1  ;;  %v788_v21 = vpack.c.bf16 %v96_v18, %v95_v17  ;;  %v790_v22 = vpack.c.bf16 %v114_v20, %v113_v19  ;;  %v97_v23 = vld [vmem:[%s1232_s1 + $0x250] sm:$0xff]  ;;  %v98_v24 = vld [vmem:[%s1232_s1 + $0x258] sm:$0xff]  ;;  %v115_v25 = vld [vmem:[%s1232_s1 + $0x2e0] sm:$0xff] }
  0x2a   :  { %779 = vmatprep.subr.bf16.mxu0 %v778_v2  ;;  %693 = vmatmul.mubr.msk.f32.vlgmr.msra.gmra.mrb[2].mxu1 %vm169_vm1, %v161_v5  ;;  %v116_v26 = vld [vmem:[%s1232_s1 + $0x2e8] sm:$0xff]  ;;  %v792_v27 = vpack.c.bf16 %v98_v24, %v97_v23  ;;  %v99_v29 = vld [vmem:[%s1232_s1 + $0x260] sm:$0xff]  ;;  %v117_v31 = vld [vmem:[%s1232_s1 + $0x2f0] sm:$0xff] }
  0x2b   :  { %703 = vmatprep.mubr.msk.f32.mxu1 %vm850_vm0, %v851_v8  ;;  %v794_v28 = vpack.c.bf16 %v116_v26, %v115_v25  ;;  %v100_v30 = vld [vmem:[%s1232_s1 + $0x268] sm:$0xff]  ;;  %v118_v32 = vld [vmem:[%s1232_s1 + $0x2f8] sm:$0xff]  ;;  %v101_v35 = vld [vmem:[%s1232_s1 + $0x270] sm:$0xff] }
  0x2c   :  { %v796_v33 = vpack.c.bf16 %v100_v30, %v99_v29  ;;  %v798_v34 = vpack.c.bf16 %v118_v32, %v117_v31  ;;  %v102_v36 = vld [vmem:[%s1232_s1 + $0x278] sm:$0xff]  ;;  %v453_v38 = vld [vmem:[%s1234_s3] sm:$0xff]  ;;  %v454_v39 = vld [vmem:[%s1234_s3 + $0x8] sm:$0xff] }
  0x2d   :  { %781 = vmatpush3.bf16.msra.mxu0 %v780_v9  ;;  %v800_v37 = vpack.c.bf16 %v102_v36, %v101_v35  ;;  %v806_v40 = vpack.c.bf16 %v454_v39, %v453_v38  ;;  %v455_v41 = vld [vmem:[%s1234_s3 + $0x10] sm:$0xff]  ;;  %v456_v42 = vld [vmem:[%s1234_s3 + $0x18] sm:$0xf]  ;;  %vm810_vm4 = vmpackc.low %vm468_vm2, %vm852_vm3 }
  0x2e   :  { %783 = vmatprep.subr.bf16.mxu0 %v782_v10  ;;  %v809_v43 = vpack.c.bf16 %v456_v42, %v455_v41  ;;  %v570_v45 = vld [vmem:[%s1233_s2] ss:$0 sm:$0xff]  ;;  %s853_s2 = smov [#allocation2]  }
  0x2f   :  { %807 = vmatpush3.bf16.msra.mxu1 %v806_v40  ;;  %v572_v61 = vld [vmem:[%s1235_s4] ss:$0 sm:$0xff]  ;;  %s562_s4 = sshll.u32 %s853_s2, 4  ;;  %s563_s4 = int_to_ptr.vmem [resolvable:$true] %s562_s4 }
  0x30   :  { %808 = vmatprep.subr.bf16.mxu1 %v849_v62  ;;  %s824_s25 = scalar_lea.vmem %s563_s4, 32  ;;  %p829_p1 = scmp.lt.s32.totalorder %s563_s4, %s563_s4 }
  0x31   :  { %785 = vmatpush3.bf16.msra.mxu0 %v784_v15  ;;  %p825_p0 = scmp.ne.s32.totalorder %s563_s4, %s824_s25  ;;  %p830_p2 = scmp.lt.s32.totalorder %s824_s25, %s824_s25 }
  0x32   :  { %787 = vmatprep.subr.bf16.mxu0 %v786_v16 }
  0x33   :  { %811 = vmatpush3.bf16.msk.msra.mxu1 %vm810_vm4, %v809_v43  ;;  %p831_p3 = por %p830_p2, %p829_p1 }
  0x35   :  { %789 = vmatpush3.bf16.msra.mxu0 %v788_v21  ;;  %p832_p4 = pnand %p831_p3, %p825_p0 }
  0x36   :  { %791 = vmatprep.subr.bf16.mxu0 %v790_v22 }
  0x39   :  { %793 = vmatpush3.bf16.msra.mxu0 %v792_v27 }
  0x3a   :  { %795 = vmatprep.subr.bf16.mxu0 %v794_v28 }
  0x3d   :  { %797 = vmatpush3.bf16.msra.mxu0 %v796_v33 }
  0x3e   :  { %799 = vmatprep.subr.bf16.mxu0 %v798_v34 }
  0x41   :  { %801 = vmatpush3.bf16.msra.mxu0 %v800_v37 }
  0x44   :  { %377 = vmatmul.mubr.f32.vlgmr.msra.gmra.mrb[2].mxu0 %v1114_v58 }
  0xf7   :  { %v607_v44 = vpop.f32.mrb[0].mxu0 }
  0xf8   :  { %v608_v46 = vpop.f32.mrb[1].mxu0 }
  0xf9   :  { %v642_v47 = vpop.f32.mrb[0].mxu1  ;;  %v609_v48 = vadd.f32 %v608_v46, %v607_v44 }
  0xfa   :  { %v643_v49 = vpop.f32.mrb[1].mxu1 }
  0xfb   :  { %v644_v50 = vadd.f32 %v643_v49, %v642_v47  ;;  %v239_v51 = vadd.f32 %v609_v48, %v570_v45 }
  0xfd   :  { %v309_v52 = vadd.f32 %v644_v50, %v239_v51  ;;  %v448_v53 = vpop.f32.mrb[2].mxu1 }
  0xfe   :  { %v694_v54 = vpop.f32.mrb[3].mxu1 }
 0x117   :  { %v677_v55 = vpop.f32.mrb[2].mxu0 }
 0x118   :  { %v678_v56 = vpop.f32.mrb[3].mxu0 }
 0x119   :  { %v679_v57 = vadd.f32 %v678_v56, %v677_v55 }
 0x11b   :  { %v379_v58 = vadd.f32 %v679_v57, %v309_v52 }
 0x11d   :  { %v449_v59 = vadd.f32 %v448_v53, %v379_v58 }
 0x11f   :  { %v452_v60 = vmax.f32 %v449_v59, 0.0 }
 0x121   :  { %704 = vmatmul.mubr.msk.f32.vlgmr.msra.gmra.mrb[4].mxu1 %vm464_vm5, %v452_v60 }
 0x1f4   :  { %v538_v62 = vpop.f32.mrb[4].mxu1 }
 0x1f5   :  { %v539_v63 = vadd.f32 %v572_v61, %v538_v62  ;;  %v705_v0 = vpop.f32.mrb[5].mxu1 }
 0x1f7   :  { %v543_v1 = vsel %vm542_vm6, %v539_v63, -inf }
 0x1f8   :  { %544 = vmax.xlane.f32.xlu0 %v543_v1 }
 0x285   :  { %v545_v2 = vpop.xlane.xlu0 %544 }
 0x286   :  { %v546_v3 = vsub.f32 %v539_v63, %v545_v2 }
 0x288   :  { %v547_v4 = vmul.f32 1.442695, %v546_v3 }
 0x28a   :  { %820 = vpow2.f32 %v547_v4 }
 0x294   :  { %v821_v5 = vpop.eup %820 }
 0x295   :  { %v549_v6 = vsel %vm542_vm6, %v821_v5, 0.0 }
 0x296   :  { %550 = vadd.xlane.f32.xlu0 %v549_v6 }
 0x323   :  { %v551_v7 = vpop.xlane.xlu0 %550 }
 0x324   :  { %822 = vlog2.f32 %v551_v7 }
 0x32e   :  { %v823_v8 = vpop.eup %822 }
 0x32f   :  { %v553_v9 = vmul.f32 0.6931472, %v823_v8 }
 0x331   :  { %v554_v10 = vsub.f32 %v546_v3, %v553_v9 }
 0x333   :  { %555 = vst.msk [vmem:[#allocation2] sm:$0x3] %vm542_vm6, %v554_v10 }
 0x334   :  { %835 = shalt.err (!%p832_p4)
}
 0x335   :  { %s836_s28 = scalar_lea.hbm %s1236_s5, 32 }
 0x336   :  { %p837_p5 = scmp.ne.s32.totalorder %s1236_s5, %s836_s28  ;;  %p840_p6 = scmp.lt.u32.totalorder %s836_s28, %s1236_s5 }
 0x338   :  { %p842_p7 = pnand %p840_p6, %p837_p5 }
 0x33a   :  { %845 = shalt.err (!%p842_p7)
}
 0x33b   :  { %565 = dma.vmem_to_hbm [thread:$0]  %s563_s4, 32, %s1236_s5, [#allocation3]  }
 0x33c   :  { %846 = dma.done.wait [#allocation3], 32  }
 0x33d   :  { %847 = vsyncadd [#allocation3], 4294967264 }
 0x33e   :  { %569 = vsyncpa [#allocation3], 1 }

</bundles_post_ra>
